<compile_context>
chip_gen: v7x
topology: tpu7x:2x2x1
jax: 0.10.0
libtpu: 0.0.40
codegen_flags: <defaults>
</compile_context>

<pallas_src>
import functools

import jax
import jax.numpy as jnp
from jax.experimental import pallas as pl
from jax.experimental.pallas import tpu as pltpu


def _layernorm(v, w, b, eps=1e-5):
    mu = jnp.mean(v, axis=-1, keepdims=True)
    var = jnp.mean((v - mu) ** 2, axis=-1, keepdims=True)
    return (v - mu) * jax.lax.rsqrt(var + eps) * w + b


def _rope_freqs(seq_len, head_dim):
    inv_freq = 1.0 / (10000.0 ** (jnp.arange(0, head_dim, 2, dtype=jnp.float32) / head_dim))
    t = jnp.arange(seq_len, dtype=jnp.float32)
    return jnp.einsum("i,j->ij", t, inv_freq)            # (N, head_dim // 2)


def _rot_half(t, hd):
    # rotate_half with the sign folded into the (signed) sin table: concat([x2, x1]).
    # Only used on cold paths (prologue) after the hoist, so the lane-slice concat is fine.
    return jnp.concatenate([t[..., hd // 2:], t[..., :hd // 2]], axis=-1)


# ---------------- prologue: LN1 + QKV projection + RoPE, once per sequence tile ----------------
def qkv_prologue_kernel(x_ref, ln1w_ref, ln1b_ref, wqkv_ref, cos_ref, sin_ref,
                        q_ref, k_ref, v_ref, *, num_heads, head_dim):
    f32, bf16 = jnp.float32, jnp.bfloat16
    nh, hd = num_heads, head_dim
    C = x_ref.shape[-1]

    h = _layernorm(x_ref[...].astype(f32), ln1w_ref[0], ln1b_ref[0]).astype(bf16)   # (T, C)
    # Single full-width MXU matmul; attention scale (hd**-0.5) pre-folded into the q columns.
    y = jnp.dot(h, wqkv_ref[...], preferred_element_type=f32)                       # (T, 3C) f32
    cos = cos_ref[...]                                                               # (T, hd)
    sin = sin_ref[...]                                                               # sign-folded

    for hh in range(nh):                       # cold path: per-head slice + RoPE + store
        q_h = y[:, hh * hd:(hh + 1) * hd]
        k_h = y[:, C + hh * hd:C + (hh + 1) * hd]
        v_h = y[:, 2 * C + hh * hd:2 * C + (hh + 1) * hd]
        q_ref[hh] = (q_h * cos + _rot_half(q_h, hd) * sin).astype(bf16)
        k_ref[hh] = (k_h * cos + _rot_half(k_h, hd) * sin).astype(bf16)
        v_ref[hh] = v_h.astype(bf16)


# ---------------- main: flash attention over (b, qi, ki) + fused out-proj / MLP epilogue --------
def attn_mlp_kernel(x_ref, q_ref, k_ref, v_ref,
                    wproj_ref, bproj_ref, ln2w_ref, ln2b_ref,
                    w1_ref, b1_ref, w2_ref, b2_ref,
                    o_ref, m_scr, l_scr, acc_scr, *, num_heads):
    f32, bf16 = jnp.float32, jnp.bfloat16
    ki = pl.program_id(2)

    @pl.when(ki == 0)
    def _():
        m_scr[...] = jnp.full_like(m_scr, -jnp.inf)
        l_scr[...] = jnp.zeros_like(l_scr)
        acc_scr[...] = jnp.zeros_like(acc_scr)

    # ---- hot kv loop: attention matmuls only (all projections hoisted to the prologue) ----
    # q/k already RoPE'd, q pre-scaled; bf16 operands, f32 MXU accumulation.
    s = jnp.einsum('hqd,hkd->hqk', q_ref[...], k_ref[...],
                   preferred_element_type=f32)                          # (nh, Tq, Tk) f32
    m_prev = m_scr[...]
    m_new = jnp.maximum(m_prev, jnp.max(s, axis=-1, keepdims=True))
    alpha = jnp.exp(m_prev - m_new)
    p = jnp.exp(s - m_new)
    l_scr[...] = alpha * l_scr[...] + jnp.sum(p, axis=-1, keepdims=True)
    acc_scr[...] = alpha * acc_scr[...] + jnp.einsum(
        'hqk,hkd->hqd', p.astype(bf16), v_ref[...], preferred_element_type=f32)
    m_scr[...] = m_new

    # ---- last kv step: deferred normalization, head-folded out-proj, residual, MLP, residual ----
    @pl.when(ki == pl.num_programs(2) - 1)
    def _():
        inv_l = pl.reciprocal(l_scr[...], approx=True)                  # (nh, Tq, 1), EUP
        xq = x_ref[...].astype(f32)                                     # (Tq, C)
        Tq, C = xq.shape
        attn_out = jnp.zeros((Tq, C), f32)
        # Per-head accumulate folds the head-sum into the projection: no (nh, Tq, C) intermediate.
        for hh in range(num_heads):
            head = (acc_scr[hh] * inv_l[hh]).astype(bf16)               # (Tq, hd)
            attn_out = attn_out + jnp.dot(head, wproj_ref[hh], preferred_element_type=f32)
        attn_out = attn_out + bproj_ref[0]
        x1 = xq + attn_out                                              # residual 1 (DropPath = id)

        h2 = _layernorm(x1, ln2w_ref[0], ln2b_ref[0])
        mm = jnp.dot(h2.astype(bf16), w1_ref[...], preferred_element_type=f32) + b1_ref[0]
        mm = jax.nn.gelu(mm, approximate=False)                         # exact erf GELU == nn.GELU()
        mm = jnp.dot(mm.astype(bf16), w2_ref[...], preferred_element_type=f32) + b2_ref[0]
        o_ref[...] = (x1 + mm).astype(o_ref.dtype)                      # residual 2 (DropPath = id)


def _pick_tile(N, max_tile=128):
    if N <= max_tile:
        return N
    for t in range(max_tile, 7, -1):
        if N % t == 0 and t % 8 == 0:
            return t
    # TODO(synk): support arbitrary N via masked tail tiles instead of a full-sequence tile.
    if N > 512:
        raise ValueError(f"seq_len={N}: no sublane-aligned tile <= {max_tile} divides it; "
                         "masked tail tiles not implemented")
    return N


def _vmem_limit_bytes():
    # ~80% of physical VMEM: ~100 MiB on v5e/v6e (128 MiB), ~52 MiB on v7x (64 MiB).
    limit = 56 * 1024 * 1024
    try:
        phys = int(pltpu.get_tpu_info().vmem_capacity_bytes)
        if phys > 0:
            limit = int(phys * 0.8)
    except Exception:
        pass
    return max(limit, 32 * 1024 * 1024)


def transformer_block(x, params, num_heads):
    B, N, C = x.shape
    assert C % num_heads == 0
    head_dim = C // num_heads
    assert head_dim % 2 == 0
    H = params["w1"].shape[1]
    scale = head_dim ** -0.5
    bf16 = jnp.bfloat16

    T = _pick_tile(N)
    n_t = N // T
    vmem_limit = _vmem_limit_bytes()

    # RoPE tables: cos + sign-folded sin (rotate_half needs no negation in-kernel).
    freqs = _rope_freqs(N, head_dim)                                    # (N, hd/2)
    cos = jnp.cos(jnp.concatenate([freqs, freqs], axis=-1))             # (N, hd)
    sin = jnp.concatenate([-jnp.sin(freqs), jnp.sin(freqs)], axis=-1)   # sign-folded

    # Weights: attention scale folded into the q columns of wqkv (in f32, then bf16 cast);
    # wproj packed head-major (nh, hd, C); MLP weights bf16.
    wqkv = jnp.concatenate([params["wqkv"][:, :C] * scale, params["wqkv"][:, C:]],
                           axis=1).astype(bf16)                          # (C, 3C)
    wproj = params["wproj"].astype(bf16).reshape(num_heads, head_dim, C)
    w1 = params["w1"].astype(bf16)
    w2 = params["w2"].astype(bf16)

    # ---------------- prologue call ----------------
    prologue = pl.pallas_call(
        functools.partial(qkv_prologue_kernel, num_heads=num_heads, head_dim=head_dim),
        out_shape=(
            jax.ShapeDtypeStruct((B, num_heads, N, head_dim), bf16),    # q (RoPE'd, pre-scaled)
            jax.ShapeDtypeStruct((B, num_heads, N, head_dim), bf16),    # k (RoPE'd)
            jax.ShapeDtypeStruct((B, num_heads, N, head_dim), bf16),    # v
        ),
        grid=(B, n_t),
        in_specs=[
            pl.BlockSpec((pl.Squeezed(), T, C), lambda b, ti: (b, ti, 0)),   # x tile
            pl.BlockSpec((1, C), lambda b, ti: (0, 0)),                      # ln1 w
            pl.BlockSpec((1, C), lambda b, ti: (0, 0)),                      # ln1 b
            pl.BlockSpec((C, 3 * C), lambda b, ti: (0, 0)),                  # wqkv (bf16, q scaled)
            pl.BlockSpec((T, head_dim), lambda b, ti: (ti, 0)),              # cos
            pl.BlockSpec((T, head_dim), lambda b, ti: (ti, 0)),              # sin (sign-folded)
        ],
        out_specs=(
            pl.BlockSpec((pl.Squeezed(), num_heads, T, head_dim), lambda b, ti: (b, 0, ti, 0)),
            pl.BlockSpec((pl.Squeezed(), num_heads, T, head_dim), lambda b, ti: (b, 0, ti, 0)),
            pl.BlockSpec((pl.Squeezed(), num_heads, T, head_dim), lambda b, ti: (b, 0, ti, 0)),
        ),
        compiler_params=pltpu.CompilerParams(
            dimension_semantics=("parallel", "parallel"),
            vmem_limit_bytes=vmem_limit),
    )
    q, k, v = prologue(x, params["ln1_w"], params["ln1_b"], wqkv, cos, sin)

    # ---------------- main call ----------------
    full2 = lambda shape: pl.BlockSpec(shape, lambda b, qi, ki: (0, 0))
    full3 = lambda shape: pl.BlockSpec(shape, lambda b, qi, ki: (0, 0, 0))
    hblk = lambda idx_map: pl.BlockSpec((pl.Squeezed(), num_heads, T, head_dim), idx_map)

    main = pl.pallas_call(
        functools.partial(attn_mlp_kernel, num_heads=num_heads),
        out_shape=jax.ShapeDtypeStruct((B, N, C), x.dtype),
        grid=(B, n_t, n_t),
        in_specs=[
            pl.BlockSpec((pl.Squeezed(), T, C), lambda b, qi, ki: (b, qi, 0)),   # x q-tile (residual)
            hblk(lambda b, qi, ki: (b, 0, qi, 0)),                               # q tile
            hblk(lambda b, qi, ki: (b, 0, ki, 0)),                               # k tile (streamed)
            hblk(lambda b, qi, ki: (b, 0, ki, 0)),                               # v tile (streamed)
            full3((num_heads, head_dim, C)),                                     # wproj (head-major)
            full2((1, C)),                                                       # proj bias
            full2((1, C)), full2((1, C)),                                        # ln2 w, b
            full2((C, H)), full2((1, H)),                                        # fc1 weight, bias
            full2((H, C)), full2((1, C)),                                        # fc2 weight, bias
        ],
        out_specs=pl.BlockSpec((pl.Squeezed(), T, C), lambda b, qi, ki: (b, qi, 0)),
        scratch_shapes=[
            pltpu.VMEM((num_heads, T, 1), jnp.float32),           # running max
            pltpu.VMEM((num_heads, T, 1), jnp.float32),           # running denom
            pltpu.VMEM((num_heads, T, head_dim), jnp.float32),    # output accumulator
        ],
        compiler_params=pltpu.CompilerParams(
            dimension_semantics=("parallel", "parallel", "arbitrary"),
            vmem_limit_bytes=vmem_limit),
    )
    return main(x, q, k, v, wproj, params["bproj"], params["ln2_w"], params["ln2_b"],
                w1, params["b1"], w2, params["b2"])


# ---------------- pure-JAX reference (sanity check vs the PyTorch semantics) ----------------
def reference_block(x, params, num_heads):
    B, N, C = x.shape
    hd = C // num_heads
    freqs = _rope_freqs(N, hd)
    emb = jnp.concatenate([freqs, freqs], axis=-1)
    cos, sin = jnp.cos(emb), jnp.sin(emb)

    def ln(v, w, b):
        mu = v.mean(-1, keepdims=True)
        var = ((v - mu) ** 2).mean(-1, keepdims=True)
        return (v - mu) / jnp.sqrt(var + 1e-5) * w + b

    def rot(t):
        t1 = t[..., :hd // 2]
        t2 = t[..., hd // 2:]
        return jnp.concatenate([-t2, t1], axis=-1)

    hp = "highest"
    h = ln(x, params["ln1_w"][0], params["ln1_b"][0])
    qkv = jnp.einsum("bnc,cd->bnd", h, params["wqkv"], precision=hp).reshape(B, N, 3, num_heads, hd)
    q = qkv[:, :, 0].transpose(0, 2, 1, 3)
    k = qkv[:, :, 1].transpose(0, 2, 1, 3)
    v = qkv[:, :, 2].transpose(0, 2, 1, 3)
    cosb, sinb = cos[None, None], sin[None, None]
    q = q * cosb + rot(q) * sinb
    k = k * cosb + rot(k) * sinb
    attn = jnp.einsum("bhnd,bhmd->bhnm", q, k, precision=hp) * hd ** -0.5
    attn = jax.nn.softmax(attn, axis=-1)
    out = jnp.einsum("bhnm,bhmd->bhnd", attn, v, precision=hp)
    out = out.transpose(0, 2, 1, 3).reshape(B, N, C)
    out = jnp.einsum("bnc,cd->bnd", out, params["wproj"], precision=hp) + params["bproj"][0]
    x1 = x + out
    h2 = ln(x1, params["ln2_w"][0], params["ln2_b"][0])
    m = jnp.einsum("bnc,ch->bnh", h2, params["w1"], precision=hp) + params["b1"][0]
    m = jax.nn.gelu(m, approximate=False)
    m = jnp.einsum("bnh,hc->bnc", m, params["w2"], precision=hp) + params["b2"][0]
    return x1 + m


if __name__ == "__main__":
    def make_params(key, C, H):
        ks = jax.random.split(key, 8)
        return {
            "ln1_w": jnp.ones((1, C), jnp.float32),
            "ln1_b": jnp.zeros((1, C), jnp.float32),
            "wqkv": 0.05 * jax.random.normal(ks[1], (C, 3 * C), jnp.float32),
            "wproj": 0.05 * jax.random.normal(ks[2], (C, C), jnp.float32),
            "bproj": 0.01 * jax.random.normal(ks[3], (1, C), jnp.float32),
            "ln2_w": jnp.ones((1, C), jnp.float32),
            "ln2_b": jnp.zeros((1, C), jnp.float32),
            "w1": 0.05 * jax.random.normal(ks[4], (C, H), jnp.float32),
            "b1": 0.01 * jax.random.normal(ks[5], (1, H), jnp.float32),
            "w2": 0.05 * jax.random.normal(ks[6], (H, C), jnp.float32),
            "b2": 0.01 * jax.random.normal(ks[7], (1, C), jnp.float32),
        }

    key = jax.random.PRNGKey(0)
    # small single-tile case + a tiled case (n_t=2) exercising the online softmax across kv tiles
    for (B, N, C, nh) in [(2, 8, 32, 4), (1, 256, 64, 4)]:
        key, kx, kp = jax.random.split(key, 3)
        H = int(C * 4.0)
        x = jax.random.normal(kx, (B, N, C), dtype=jnp.float32)
        params = make_params(kp, C, H)

        out = jax.block_until_ready(transformer_block(x, params, nh))
        ref = jax.block_until_ready(reference_block(x, params, nh))

        assert out.shape == (B, N, C)
        assert bool(jnp.all(jnp.isfinite(out)))
        # bf16 MXU operands (f32 accumulation) + approx reciprocal -> relaxed tolerance vs f32 ref
        max_err = float(jnp.max(jnp.abs(out - ref)))
        assert jnp.allclose(out, ref, rtol=2e-2, atol=2e-2), (B, N, C, nh, max_err)

    print("KERNEL_OK")
</pallas_src>

<mosaic_0001>
module attributes {stable_mosaic.version = 11 : i64} {
  func.func @qkv_prologue_kernel(%arg0: i32, %arg1: i32, %arg2: memref<1x8x32xf32, #tpu.memory_space<vmem>>, %arg3: memref<1x32xf32, #tpu.memory_space<vmem>>, %arg4: memref<1x32xf32, #tpu.memory_space<vmem>>, %arg5: memref<32x96xbf16, #tpu.memory_space<vmem>>, %arg6: memref<8x8xf32, #tpu.memory_space<vmem>>, %arg7: memref<8x8xf32, #tpu.memory_space<vmem>>, %arg8: memref<1x4x8x8xbf16, #tpu.memory_space<vmem>>, %arg9: memref<1x4x8x8xbf16, #tpu.memory_space<vmem>>, %arg10: memref<1x4x8x8xbf16, #tpu.memory_space<vmem>>) attributes {dimension_semantics = [#tpu.dimension_semantics<parallel>, #tpu.dimension_semantics<parallel>], iteration_bounds = array<i64: 2, 1>, scalar_prefetch = 0 : i64, scratch_operands = 0 : i64, tpu.core_type = #tpu.core_type<tc>, window_params = [{transform_indices = @transform_0, window_bounds = array<i64: 1, 8, 32>}, {pipeline_mode = #tpu.pipeline_mode<synchronous>, transform_indices = @transform_1, window_bounds = array<i64: 1, 32>}, {pipeline_mode = #tpu.pipeline_mode<synchronous>, transform_indices = @transform_2, window_bounds = array<i64: 1, 32>}, {pipeline_mode = #tpu.pipeline_mode<synchronous>, transform_indices = @transform_3, window_bounds = array<i64: 32, 96>}, {transform_indices = @transform_4, window_bounds = array<i64: 8, 8>}, {transform_indices = @transform_5, window_bounds = array<i64: 8, 8>}, {transform_indices = @transform_6, window_bounds = array<i64: 1, 4, 8, 8>}, {transform_indices = @transform_7, window_bounds = array<i64: 1, 4, 8, 8>}, {transform_indices = @transform_8, window_bounds = array<i64: 1, 4, 8, 8>}]} {
    %c0 = arith.constant 0 : index
    %c0_0 = arith.constant 0 : index
    %c0_1 = arith.constant 0 : index
    %0 = vector.load %arg2[%c0, %c0_0, %c0_1] : memref<1x8x32xf32, #tpu.memory_space<vmem>>, vector<1x8x32xf32>
    %1 = vector.shape_cast %0 : vector<1x8x32xf32> to vector<8x32xf32>
    %c0_2 = arith.constant 0 : index
    %c0_3 = arith.constant 0 : index
    %2 = vector.load %arg3[%c0_2, %c0_3] : memref<1x32xf32, #tpu.memory_space<vmem>>, vector<1x32xf32>
    %3 = vector.shape_cast %2 : vector<1x32xf32> to vector<32xf32>
    %c0_4 = arith.constant 0 : index
    %c0_5 = arith.constant 0 : index
    %4 = vector.load %arg4[%c0_4, %c0_5] : memref<1x32xf32, #tpu.memory_space<vmem>>, vector<1x32xf32>
    %5 = vector.shape_cast %4 : vector<1x32xf32> to vector<32xf32>
    %cst = arith.constant dense<0.000000e+00> : vector<8xf32>
    %6 = vector.multi_reduction <add>, %1, %cst [1] : vector<8x32xf32> to vector<8xf32>
    %7 = vector.shape_cast %6 : vector<8xf32> to vector<8x1xf32>
    %cst_6 = arith.constant 3.200000e+01 : f32
    %8 = vector.broadcast %cst_6 : f32 to vector<8x1xf32>
    %9 = arith.divf %7, %8 : vector<8x1xf32>
    %10 = vector.broadcast %9 : vector<8x1xf32> to vector<8x32xf32>
    %11 = arith.subf %1, %10 : vector<8x32xf32>
    %12 = arith.mulf %11, %11 : vector<8x32xf32>
    %cst_7 = arith.constant dense<0.000000e+00> : vector<8xf32>
    %13 = vector.multi_reduction <add>, %12, %cst_7 [1] : vector<8x32xf32> to vector<8xf32>
    %14 = vector.shape_cast %13 : vector<8xf32> to vector<8x1xf32>
    %cst_8 = arith.constant 3.200000e+01 : f32
    %15 = vector.broadcast %cst_8 : f32 to vector<8x1xf32>
    %16 = arith.divf %14, %15 : vector<8x1xf32>
    %17 = vector.broadcast %9 : vector<8x1xf32> to vector<8x32xf32>
    %18 = arith.subf %1, %17 : vector<8x32xf32>
    %cst_9 = arith.constant 9.99999974E-6 : f32
    %19 = vector.broadcast %cst_9 : f32 to vector<8x1xf32>
    %20 = arith.addf %16, %19 : vector<8x1xf32>
    %21 = math.rsqrt %20 : vector<8x1xf32>
    %22 = vector.broadcast %21 : vector<8x1xf32> to vector<8x32xf32>
    %23 = arith.mulf %18, %22 : vector<8x32xf32>
    %24 = vector.shape_cast %3 : vector<32xf32> to vector<1x32xf32>
    %25 = vector.broadcast %24 : vector<1x32xf32> to vector<8x32xf32>
    %26 = arith.mulf %23, %25 : vector<8x32xf32>
    %27 = vector.shape_cast %5 : vector<32xf32> to vector<1x32xf32>
    %28 = vector.broadcast %27 : vector<1x32xf32> to vector<8x32xf32>
    %29 = arith.addf %26, %28 : vector<8x32xf32>
    %30 = arith.truncf %29 : vector<8x32xf32> to vector<8x32xbf16>
    %c0_10 = arith.constant 0 : index
    %c0_11 = arith.constant 0 : index
    %31 = vector.load %arg5[%c0_10, %c0_11] : memref<32x96xbf16, #tpu.memory_space<vmem>>, vector<32x96xbf16>
    %cst_12 = arith.constant dense<0.000000e+00> : vector<8x96xf32>
    %32 = tpu.matmul %30, %31, %cst_12 {dimension_numbers = #tpu.dot_dimension_numbers<[1], [0], [0], [1], [0, 0, 1, 1], [], []>} : vector<8x32xbf16>, vector<32x96xbf16>, vector<8x96xf32> -> vector<8x96xf32>
    %c0_13 = arith.constant 0 : index
    %c0_14 = arith.constant 0 : index
    %33 = vector.load %arg6[%c0_13, %c0_14] : memref<8x8xf32, #tpu.memory_space<vmem>>, vector<8x8xf32>
    %c0_15 = arith.constant 0 : index
    %c0_16 = arith.constant 0 : index
    %34 = vector.load %arg7[%c0_15, %c0_16] : memref<8x8xf32, #tpu.memory_space<vmem>>, vector<8x8xf32>
    %35 = vector.extract_strided_slice %32 {offsets = [0, 0], sizes = [8, 8], strides = [1, 1]} : vector<8x96xf32> to vector<8x8xf32>
    %36 = vector.extract_strided_slice %32 {offsets = [0, 32], sizes = [8, 8], strides = [1, 1]} : vector<8x96xf32> to vector<8x8xf32>
    %37 = vector.extract_strided_slice %32 {offsets = [0, 64], sizes = [8, 8], strides = [1, 1]} : vector<8x96xf32> to vector<8x8xf32>
    %38 = arith.mulf %35, %33 : vector<8x8xf32>
    %39 = vector.extract_strided_slice %35 {offsets = [0, 4], sizes = [8, 4], strides = [1, 1]} : vector<8x8xf32> to vector<8x4xf32>
    %40 = vector.extract_strided_slice %35 {offsets = [0, 0], sizes = [8, 4], strides = [1, 1]} : vector<8x8xf32> to vector<8x4xf32>
    %41 = tpu.concatenate %39, %40 in 1 : vector<8x4xf32>, vector<8x4xf32> -> vector<8x8xf32>
    %42 = arith.mulf %41, %34 : vector<8x8xf32>
    %43 = arith.addf %38, %42 : vector<8x8xf32>
    %44 = arith.truncf %43 : vector<8x8xf32> to vector<8x8xbf16>
    %c0_17 = arith.constant 0 : index
    %c0_18 = arith.constant 0 : index
    %c0_19 = arith.constant 0 : index
    %c0_20 = arith.constant 0 : index
    %45 = vector.load %arg8[%c0_17, %c0_18, %c0_19, %c0_20] : memref<1x4x8x8xbf16, #tpu.memory_space<vmem>>, vector<1x1x8x8xbf16>
    %46 = vector.shape_cast %45 : vector<1x1x8x8xbf16> to vector<8x8xbf16>
    %47 = vector.shape_cast %44 : vector<8x8xbf16> to vector<1x1x8x8xbf16>
    tpu.vector_store %arg8[%c0_17, %c0_18, %c0_19, %c0_20], %47 {strides = array<i32>} : memref<1x4x8x8xbf16, #tpu.memory_space<vmem>>, vector<1x1x8x8xbf16>,
    %48 = arith.mulf %36, %33 : vector<8x8xf32>
    %49 = vector.extract_strided_slice %36 {offsets = [0, 4], sizes = [8, 4], strides = [1, 1]} : vector<8x8xf32> to vector<8x4xf32>
    %50 = vector.extract_strided_slice %36 {offsets = [0, 0], sizes = [8, 4], strides = [1, 1]} : vector<8x8xf32> to vector<8x4xf32>
    %51 = tpu.concatenate %49, %50 in 1 : vector<8x4xf32>, vector<8x4xf32> -> vector<8x8xf32>
    %52 = arith.mulf %51, %34 : vector<8x8xf32>
    %53 = arith.addf %48, %52 : vector<8x8xf32>
    %54 = arith.truncf %53 : vector<8x8xf32> to vector<8x8xbf16>
    %c0_21 = arith.constant 0 : index
    %c0_22 = arith.constant 0 : index
    %c0_23 = arith.constant 0 : index
    %c0_24 = arith.constant 0 : index
    %55 = vector.load %arg9[%c0_21, %c0_22, %c0_23, %c0_24] : memref<1x4x8x8xbf16, #tpu.memory_space<vmem>>, vector<1x1x8x8xbf16>
    %56 = vector.shape_cast %55 : vector<1x1x8x8xbf16> to vector<8x8xbf16>
    %57 = vector.shape_cast %54 : vector<8x8xbf16> to vector<1x1x8x8xbf16>
    tpu.vector_store %arg9[%c0_21, %c0_22, %c0_23, %c0_24], %57 {strides = array<i32>} : memref<1x4x8x8xbf16, #tpu.memory_space<vmem>>, vector<1x1x8x8xbf16>,
    %58 = arith.truncf %37 : vector<8x8xf32> to vector<8x8xbf16>
    %c0_25 = arith.constant 0 : index
    %c0_26 = arith.constant 0 : index
    %c0_27 = arith.constant 0 : index
    %c0_28 = arith.constant 0 : index
    %59 = vector.load %arg10[%c0_25, %c0_26, %c0_27, %c0_28] : memref<1x4x8x8xbf16, #tpu.memory_space<vmem>>, vector<1x1x8x8xbf16>
    %60 = vector.shape_cast %59 : vector<1x1x8x8xbf16> to vector<8x8xbf16>
    %61 = vector.shape_cast %58 : vector<8x8xbf16> to vector<1x1x8x8xbf16>
    tpu.vector_store %arg10[%c0_25, %c0_26, %c0_27, %c0_28], %61 {strides = array<i32>} : memref<1x4x8x8xbf16, #tpu.memory_space<vmem>>, vector<1x1x8x8xbf16>,
    %62 = vector.extract_strided_slice %32 {offsets = [0, 8], sizes = [8, 8], strides = [1, 1]} : vector<8x96xf32> to vector<8x8xf32>
    %63 = vector.extract_strided_slice %32 {offsets = [0, 40], sizes = [8, 8], strides = [1, 1]} : vector<8x96xf32> to vector<8x8xf32>
    %64 = vector.extract_strided_slice %32 {offsets = [0, 72], sizes = [8, 8], strides = [1, 1]} : vector<8x96xf32> to vector<8x8xf32>
    %65 = arith.mulf %62, %33 : vector<8x8xf32>
    %66 = vector.extract_strided_slice %62 {offsets = [0, 4], sizes = [8, 4], strides = [1, 1]} : vector<8x8xf32> to vector<8x4xf32>
    %67 = vector.extract_strided_slice %62 {offsets = [0, 0], sizes = [8, 4], strides = [1, 1]} : vector<8x8xf32> to vector<8x4xf32>
    %68 = tpu.concatenate %66, %67 in 1 : vector<8x4xf32>, vector<8x4xf32> -> vector<8x8xf32>
    %69 = arith.mulf %68, %34 : vector<8x8xf32>
    %70 = arith.addf %65, %69 : vector<8x8xf32>
    %71 = arith.truncf %70 : vector<8x8xf32> to vector<8x8xbf16>
    %c0_29 = arith.constant 0 : index
    %c1 = arith.constant 1 : index
    %c0_30 = arith.constant 0 : index
    %c0_31 = arith.constant 0 : index
    %72 = vector.load %arg8[%c0_29, %c1, %c0_30, %c0_31] : memref<1x4x8x8xbf16, #tpu.memory_space<vmem>>, vector<1x1x8x8xbf16>
    %73 = vector.shape_cast %72 : vector<1x1x8x8xbf16> to vector<8x8xbf16>
    %74 = vector.shape_cast %71 : vector<8x8xbf16> to vector<1x1x8x8xbf16>
    tpu.vector_store %arg8[%c0_29, %c1, %c0_30, %c0_31], %74 {strides = array<i32>} : memref<1x4x8x8xbf16, #tpu.memory_space<vmem>>, vector<1x1x8x8xbf16>,
    %75 = arith.mulf %63, %33 : vector<8x8xf32>
    %76 = vector.extract_strided_slice %63 {offsets = [0, 4], sizes = [8, 4], strides = [1, 1]} : vector<8x8xf32> to vector<8x4xf32>
    %77 = vector.extract_strided_slice %63 {offsets = [0, 0], sizes = [8, 4], strides = [1, 1]} : vector<8x8xf32> to vector<8x4xf32>
    %78 = tpu.concatenate %76, %77 in 1 : vector<8x4xf32>, vector<8x4xf32> -> vector<8x8xf32>
    %79 = arith.mulf %78, %34 : vector<8x8xf32>
    %80 = arith.addf %75, %79 : vector<8x8xf32>
    %81 = arith.truncf %80 : vector<8x8xf32> to vector<8x8xbf16>
    %c0_32 = arith.constant 0 : index
    %c1_33 = arith.constant 1 : index
    %c0_34 = arith.constant 0 : index
    %c0_35 = arith.constant 0 : index
    %82 = vector.load %arg9[%c0_32, %c1_33, %c0_34, %c0_35] : memref<1x4x8x8xbf16, #tpu.memory_space<vmem>>, vector<1x1x8x8xbf16>
    %83 = vector.shape_cast %82 : vector<1x1x8x8xbf16> to vector<8x8xbf16>
    %84 = vector.shape_cast %81 : vector<8x8xbf16> to vector<1x1x8x8xbf16>
    tpu.vector_store %arg9[%c0_32, %c1_33, %c0_34, %c0_35], %84 {strides = array<i32>} : memref<1x4x8x8xbf16, #tpu.memory_space<vmem>>, vector<1x1x8x8xbf16>,
    %85 = arith.truncf %64 : vector<8x8xf32> to vector<8x8xbf16>
    %c0_36 = arith.constant 0 : index
    %c1_37 = arith.constant 1 : index
    %c0_38 = arith.constant 0 : index
    %c0_39 = arith.constant 0 : index
    %86 = vector.load %arg10[%c0_36, %c1_37, %c0_38, %c0_39] : memref<1x4x8x8xbf16, #tpu.memory_space<vmem>>, vector<1x1x8x8xbf16>
    %87 = vector.shape_cast %86 : vector<1x1x8x8xbf16> to vector<8x8xbf16>
    %88 = vector.shape_cast %85 : vector<8x8xbf16> to vector<1x1x8x8xbf16>
    tpu.vector_store %arg10[%c0_36, %c1_37, %c0_38, %c0_39], %88 {strides = array<i32>} : memref<1x4x8x8xbf16, #tpu.memory_space<vmem>>, vector<1x1x8x8xbf16>,
    %89 = vector.extract_strided_slice %32 {offsets = [0, 16], sizes = [8, 8], strides = [1, 1]} : vector<8x96xf32> to vector<8x8xf32>
    %90 = vector.extract_strided_slice %32 {offsets = [0, 48], sizes = [8, 8], strides = [1, 1]} : vector<8x96xf32> to vector<8x8xf32>
    %91 = vector.extract_strided_slice %32 {offsets = [0, 80], sizes = [8, 8], strides = [1, 1]} : vector<8x96xf32> to vector<8x8xf32>
    %92 = arith.mulf %89, %33 : vector<8x8xf32>
    %93 = vector.extract_strided_slice %89 {offsets = [0, 4], sizes = [8, 4], strides = [1, 1]} : vector<8x8xf32> to vector<8x4xf32>
    %94 = vector.extract_strided_slice %89 {offsets = [0, 0], sizes = [8, 4], strides = [1, 1]} : vector<8x8xf32> to vector<8x4xf32>
    %95 = tpu.concatenate %93, %94 in 1 : vector<8x4xf32>, vector<8x4xf32> -> vector<8x8xf32>
    %96 = arith.mulf %95, %34 : vector<8x8xf32>
    %97 = arith.addf %92, %96 : vector<8x8xf32>
    %98 = arith.truncf %97 : vector<8x8xf32> to vector<8x8xbf16>
    %c0_40 = arith.constant 0 : index
    %c2 = arith.constant 2 : index
    %c0_41 = arith.constant 0 : index
    %c0_42 = arith.constant 0 : index
    %99 = vector.load %arg8[%c0_40, %c2, %c0_41, %c0_42] : memref<1x4x8x8xbf16, #tpu.memory_space<vmem>>, vector<1x1x8x8xbf16>
    %100 = vector.shape_cast %99 : vector<1x1x8x8xbf16> to vector<8x8xbf16>
    %101 = vector.shape_cast %98 : vector<8x8xbf16> to vector<1x1x8x8xbf16>
    tpu.vector_store %arg8[%c0_40, %c2, %c0_41, %c0_42], %101 {strides = array<i32>} : memref<1x4x8x8xbf16, #tpu.memory_space<vmem>>, vector<1x1x8x8xbf16>,
    %102 = arith.mulf %90, %33 : vector<8x8xf32>
    %103 = vector.extract_strided_slice %90 {offsets = [0, 4], sizes = [8, 4], strides = [1, 1]} : vector<8x8xf32> to vector<8x4xf32>
    %104 = vector.extract_strided_slice %90 {offsets = [0, 0], sizes = [8, 4], strides = [1, 1]} : vector<8x8xf32> to vector<8x4xf32>
    %105 = tpu.concatenate %103, %104 in 1 : vector<8x4xf32>, vector<8x4xf32> -> vector<8x8xf32>
    %106 = arith.mulf %105, %34 : vector<8x8xf32>
    %107 = arith.addf %102, %106 : vector<8x8xf32>
    %108 = arith.truncf %107 : vector<8x8xf32> to vector<8x8xbf16>
    %c0_43 = arith.constant 0 : index
    %c2_44 = arith.constant 2 : index
    %c0_45 = arith.constant 0 : index
    %c0_46 = arith.constant 0 : index
    %109 = vector.load %arg9[%c0_43, %c2_44, %c0_45, %c0_46] : memref<1x4x8x8xbf16, #tpu.memory_space<vmem>>, vector<1x1x8x8xbf16>
    %110 = vector.shape_cast %109 : vector<1x1x8x8xbf16> to vector<8x8xbf16>
    %111 = vector.shape_cast %108 : vector<8x8xbf16> to vector<1x1x8x8xbf16>
    tpu.vector_store %arg9[%c0_43, %c2_44, %c0_45, %c0_46], %111 {strides = array<i32>} : memref<1x4x8x8xbf16, #tpu.memory_space<vmem>>, vector<1x1x8x8xbf16>,
    %112 = arith.truncf %91 : vector<8x8xf32> to vector<8x8xbf16>
    %c0_47 = arith.constant 0 : index
    %c2_48 = arith.constant 2 : index
    %c0_49 = arith.constant 0 : index
    %c0_50 = arith.constant 0 : index
    %113 = vector.load %arg10[%c0_47, %c2_48, %c0_49, %c0_50] : memref<1x4x8x8xbf16, #tpu.memory_space<vmem>>, vector<1x1x8x8xbf16>
    %114 = vector.shape_cast %113 : vector<1x1x8x8xbf16> to vector<8x8xbf16>
    %115 = vector.shape_cast %112 : vector<8x8xbf16> to vector<1x1x8x8xbf16>
    tpu.vector_store %arg10[%c0_47, %c2_48, %c0_49, %c0_50], %115 {strides = array<i32>} : memref<1x4x8x8xbf16, #tpu.memory_space<vmem>>, vector<1x1x8x8xbf16>,
    %116 = vector.extract_strided_slice %32 {offsets = [0, 24], sizes = [8, 8], strides = [1, 1]} : vector<8x96xf32> to vector<8x8xf32>
    %117 = vector.extract_strided_slice %32 {offsets = [0, 56], sizes = [8, 8], strides = [1, 1]} : vector<8x96xf32> to vector<8x8xf32>
    %118 = vector.extract_strided_slice %32 {offsets = [0, 88], sizes = [8, 8], strides = [1, 1]} : vector<8x96xf32> to vector<8x8xf32>
    %119 = arith.mulf %116, %33 : vector<8x8xf32>
    %120 = vector.extract_strided_slice %116 {offsets = [0, 4], sizes = [8, 4], strides = [1, 1]} : vector<8x8xf32> to vector<8x4xf32>
    %121 = vector.extract_strided_slice %116 {offsets = [0, 0], sizes = [8, 4], strides = [1, 1]} : vector<8x8xf32> to vector<8x4xf32>
    %122 = tpu.concatenate %120, %121 in 1 : vector<8x4xf32>, vector<8x4xf32> -> vector<8x8xf32>
    %123 = arith.mulf %122, %34 : vector<8x8xf32>
    %124 = arith.addf %119, %123 : vector<8x8xf32>
    %125 = arith.truncf %124 : vector<8x8xf32> to vector<8x8xbf16>
    %c0_51 = arith.constant 0 : index
    %c3 = arith.constant 3 : index
    %c0_52 = arith.constant 0 : index
    %c0_53 = arith.constant 0 : index
    %126 = vector.load %arg8[%c0_51, %c3, %c0_52, %c0_53] : memref<1x4x8x8xbf16, #tpu.memory_space<vmem>>, vector<1x1x8x8xbf16>
    %127 = vector.shape_cast %126 : vector<1x1x8x8xbf16> to vector<8x8xbf16>
    %128 = vector.shape_cast %125 : vector<8x8xbf16> to vector<1x1x8x8xbf16>
    tpu.vector_store %arg8[%c0_51, %c3, %c0_52, %c0_53], %128 {strides = array<i32>} : memref<1x4x8x8xbf16, #tpu.memory_space<vmem>>, vector<1x1x8x8xbf16>,
    %129 = arith.mulf %117, %33 : vector<8x8xf32>
    %130 = vector.extract_strided_slice %117 {offsets = [0, 4], sizes = [8, 4], strides = [1, 1]} : vector<8x8xf32> to vector<8x4xf32>
    %131 = vector.extract_strided_slice %117 {offsets = [0, 0], sizes = [8, 4], strides = [1, 1]} : vector<8x8xf32> to vector<8x4xf32>
    %132 = tpu.concatenate %130, %131 in 1 : vector<8x4xf32>, vector<8x4xf32> -> vector<8x8xf32>
    %133 = arith.mulf %132, %34 : vector<8x8xf32>
    %134 = arith.addf %129, %133 : vector<8x8xf32>
    %135 = arith.truncf %134 : vector<8x8xf32> to vector<8x8xbf16>
    %c0_54 = arith.constant 0 : index
    %c3_55 = arith.constant 3 : index
    %c0_56 = arith.constant 0 : index
    %c0_57 = arith.constant 0 : index
    %136 = vector.load %arg9[%c0_54, %c3_55, %c0_56, %c0_57] : memref<1x4x8x8xbf16, #tpu.memory_space<vmem>>, vector<1x1x8x8xbf16>
    %137 = vector.shape_cast %136 : vector<1x1x8x8xbf16> to vector<8x8xbf16>
    %138 = vector.shape_cast %135 : vector<8x8xbf16> to vector<1x1x8x8xbf16>
    tpu.vector_store %arg9[%c0_54, %c3_55, %c0_56, %c0_57], %138 {strides = array<i32>} : memref<1x4x8x8xbf16, #tpu.memory_space<vmem>>, vector<1x1x8x8xbf16>,
    %139 = arith.truncf %118 : vector<8x8xf32> to vector<8x8xbf16>
    %c0_58 = arith.constant 0 : index
    %c3_59 = arith.constant 3 : index
    %c0_60 = arith.constant 0 : index
    %c0_61 = arith.constant 0 : index
    %140 = vector.load %arg10[%c0_58, %c3_59, %c0_60, %c0_61] : memref<1x4x8x8xbf16, #tpu.memory_space<vmem>>, vector<1x1x8x8xbf16>
    %141 = vector.shape_cast %140 : vector<1x1x8x8xbf16> to vector<8x8xbf16>
    %142 = vector.shape_cast %139 : vector<8x8xbf16> to vector<1x1x8x8xbf16>
    tpu.vector_store %arg10[%c0_58, %c3_59, %c0_60, %c0_61], %142 {strides = array<i32>} : memref<1x4x8x8xbf16, #tpu.memory_space<vmem>>, vector<1x1x8x8xbf16>,
    return
  }
  func.func @transform_0(%arg0: i32, %arg1: i32) -> (i32, i32, i32) {
    %c0_i32 = arith.constant 0 : i32
    %c0_i32_0 = arith.constant 0 : i32
    return %arg0, %arg1, %c0_i32 : i32, i32, i32
  }
  func.func @transform_1(%arg0: i32, %arg1: i32) -> (i32, i32) {
    %c0_i32 = arith.constant 0 : i32
    %c0_i32_0 = arith.constant 0 : i32
    %c0_i32_1 = arith.constant 0 : i32
    return %c0_i32, %c0_i32_0 : i32, i32
  }
  func.func @transform_2(%arg0: i32, %arg1: i32) -> (i32, i32) {
    %c0_i32 = arith.constant 0 : i32
    %c0_i32_0 = arith.constant 0 : i32
    %c0_i32_1 = arith.constant 0 : i32
    return %c0_i32, %c0_i32_0 : i32, i32
  }
  func.func @transform_3(%arg0: i32, %arg1: i32) -> (i32, i32) {
    %c0_i32 = arith.constant 0 : i32
    %c0_i32_0 = arith.constant 0 : i32
    %c0_i32_1 = arith.constant 0 : i32
    return %c0_i32, %c0_i32_0 : i32, i32
  }
  func.func @transform_4(%arg0: i32, %arg1: i32) -> (i32, i32) {
    %c0_i32 = arith.constant 0 : i32
    %c0_i32_0 = arith.constant 0 : i32
    return %arg1, %c0_i32 : i32, i32
  }
  func.func @transform_5(%arg0: i32, %arg1: i32) -> (i32, i32) {
    %c0_i32 = arith.constant 0 : i32
    %c0_i32_0 = arith.constant 0 : i32
    return %arg1, %c0_i32 : i32, i32
  }
  func.func @transform_6(%arg0: i32, %arg1: i32) -> (i32, i32, i32, i32) {
    %c0_i32 = arith.constant 0 : i32
    %c0_i32_0 = arith.constant 0 : i32
    %c0_i32_1 = arith.constant 0 : i32
    return %arg0, %c0_i32, %arg1, %c0_i32_0 : i32, i32, i32, i32
  }
  func.func @transform_7(%arg0: i32, %arg1: i32) -> (i32, i32, i32, i32) {
    %c0_i32 = arith.constant 0 : i32
    %c0_i32_0 = arith.constant 0 : i32
    %c0_i32_1 = arith.constant 0 : i32
    return %arg0, %c0_i32, %arg1, %c0_i32_0 : i32, i32, i32, i32
  }
  func.func @transform_8(%arg0: i32, %arg1: i32) -> (i32, i32, i32, i32) {
    %c0_i32 = arith.constant 0 : i32
    %c0_i32_0 = arith.constant 0 : i32
    %c0_i32_1 = arith.constant 0 : i32
    return %arg0, %c0_i32, %arg1, %c0_i32_0 : i32, i32, i32, i32
  }
}

</mosaic_0001>

<bundles_post_ra>
// kernel: tpu_custom_call.1
= control target key start
LH: loop header
LB: loop body
LE: loop exit
PB: predicated region body
PF: predicated region fallthrough
CT: control target
= control target key end

     0   :  { %s1814_s0 = inlined_call_operand.hbm [shape: f32[2,8,32], index: 0, kind: input, shape index: {}]   ;;  %s1815_s1 = inlined_call_operand.vmem [shape: f32[1,32], index: 1, kind: input, shape index: {}]   ;;  %s1816_s2 = inlined_call_operand.vmem [shape: f32[1,32], index: 2, kind: input, shape index: {}]   ;;  %s1817_s3 = inlined_call_operand.hbm [shape: bf16[32,96], index: 3, kind: input, shape index: {}]   ;;  %s1818_s4 = inlined_call_operand.vmem [shape: f32[8,8], index: 4, kind: input, shape index: {}]   ;;  %s1819_s5 = inlined_call_operand.vmem [shape: f32[8,8], index: 5, kind: input, shape index: {}]   ;;  %s1820_s6 = inlined_call_operand.hbm [shape: bf16[2,4,8,8], index: 6, kind: output, shape index: {0}]   ;;  %s1821_s7 = inlined_call_operand.hbm [shape: bf16[2,4,8,8], index: 7, kind: output, shape index: {1}]   ;;  %s1822_s8 = inlined_call_operand.hbm [shape: bf16[2,4,8,8], index: 8, kind: output, shape index: {2}]  }
   0x1   :  { %1833 = sst [smem:[#allocation17_spill]] %s1814_s0 }
   0x2   :  { %1834 = sst [smem:[#allocation18_spill]] %s1817_s3 }
   0x3   :  { %14 = vsyncpa [#allocation3], 0 }
   0x4   :  { %16 = vsyncpa [#allocation3 + $0x1], 0 }
   0x5   :  { %17 = vsyncpa [#allocation6], 0 }
   0x6   :  { %18 = vsyncpa [#allocation4], 0 }
   0x7   :  { %20 = vsyncpa [#allocation4 + $0x1], 0 }
   0x8   :  { %21 = vsyncpa [#allocation9], 0 }
   0x9   :  { %23 = vsyncpa [#allocation9 + $0x1], 0  ;;  %s1420_s27 = smov 0   ;;  %s1422_s28 = smov 0  }
   0xa   :  { %s1424_s29 = smov 0   ;;  %s1426_s30 = smov 0  }
   0xb   :  { %s1428_s9 = smov 0   ;;  %s1430_s10 = smov 0  }
   0xc LB: > { %s1451_s11 = sadd.s32 4294967295, %s1340_s10   ;;  %s1826_s12 = sadd.s32 4294967294, %s1340_s10   ;;  %s1340_s10 = sphi %s1430_s10, %s29_s10   ;;  %s1336_s9 = sphi %s1428_s9, %s1862_s9   ;;  %s1332_s30 = sphi %s1426_s30, %s1861_s30   ;;  %s1328_s29 = sphi %s1424_s29, %s1860_s29   ;;  %s1324_s28 = sphi %s1422_s28, %s1859_s28   ;;  %s1320_s27 = sphi %s1420_s27, %s1858_s27  }
   0xd   : > { %p63_p0 = scmp.ne.s32.totalorder %s1324_s28, %s1320_s27  ;;  %p1823_p1 = scmp.eq.s32.totalorder %s1451_s11, 0 }
   0xe   : > { %p210_p3 = scmp.eq.s32.totalorder %s1826_s12, 1  ;;  %p953_p5 = scmp.ge.s32.totalorder %s1340_s10, 1 }
   0xf   : > { %p1462_p4 = por %p1823_p1, %p63_p0  ;;  %p273_p7 = scmp.lt.s32.totalorder %s1340_s10, 3 }
  0x10   : > { %p1467_p6 = por %p210_p3, %p63_p0  ;;  %s1342_s16 = smov [#allocation5]  }
  0x11   : > { %s1835_s13 = scalar_select %p1462_p4, 1, 0 }
  0x12   : > { %s1836_s14 = scalar_select %p1467_p6, 1, 0 }
  0x13   : > { %p1472_p8 = pnand %p953_p5, %p273_p7  ;;  %s291_s17 = sshll.u32 %s1342_s16, 4  ;;  %s292_s17 = int_to_ptr.vmem [resolvable:$true] %s291_s17 }
  0x14   : > { %1837 = sst [smem:[#allocation15_spill]] %s1836_s14  ;;  %s41_s19 = sadd.s32 1, %s1336_s9 }
  0x15   : > { %s1838_s15 = scalar_select %p1472_p8, 1, 0 }
  0x16   : > { %p1033_p9 = pneg %p1472_p8  ;;  %s1840_s3 = sld [smem:[#allocation18_spill]] }
  0x18   : > { %p1481_p11 = pnand %p1033_p9, %p1823_p1 }
  0x1a   : > { %p1138_p13 = pneg %p1481_p11 }
  0x1c   : > { %s1136_s22 = scalar_lea.hbm %s1840_s3, 256 }
  0x1d   : > { %p1137_p12 = scmp.ne.s32.totalorder %s1840_s3, %s1136_s22  ;;  %p1143_p5 = scmp.lt.u32.totalorder %s1136_s22, %s1840_s3 }
  0x1f   : > { %p1139_p0 = pnand %p1138_p13, %p1137_p12 }
  0x21   : > { %p1140_p3 = pneg %p1139_p0 }
  0x23   : > { %p1145_p7 = pnand %p1143_p5, %p1140_p3 }
  0x25   : > { %1148 = shalt.err (!%p1145_p7)
}
  0x26   : > { %s1149_s16 = scalar_lea.vmem %s292_s17, 256  ;;  %p1157_p2 = scmp.lt.s32.totalorder %s292_s17, %s292_s17 }
  0x27   : > { %p1150_p9 = scmp.ne.s32.totalorder %s292_s17, %s1149_s16  ;;  %p1158_p6 = scmp.lt.s32.totalorder %s1149_s16, %s1149_s16 }
  0x29   : > { %p1152_p10 = pnand %p1150_p9, %p1138_p13  ;;  %p1159_p4 = por %p1158_p6, %p1157_p2 }
  0x2b   : > { %p1153_p1 = pneg %p1152_p10 }
  0x2d   : > { %p1160_p8 = pnand %p1159_p4, %p1153_p1 }
  0x2f   : > { %1163 = shalt.err (!%p1160_p8)
}
  0x30   : > { %s1343_s20 = smov 64   ;;  %s1344_s21 = smov 4  }
  0x31   : > { %1036 = dma.hbm_to_vmem [thread:$0]  (!%p1481_p11), %s1840_s3, 256, %s292_s17, [#allocation6], %s1343_s20, %s1343_s20, %s1344_s21  }
  0x32   : > { %p43_p1 = scmp.ge.s32.totalorder %s41_s19, 2  ;;  %s50_s24 = sadd.s32 1, %s1328_s29 }
  0x33   : > { %p57_p2 = scmp.ne.s32.totalorder %s1328_s29, %s1324_s28  ;;  %p58_p4 = scmp.eq.s32.totalorder %s1340_s10, 0 }
  0x34   : > { %s1864_s19 = smov (%p43_p1, %s41_s19), 0  ;;  %p1843_p8 = scmp.eq.s32.totalorder %s1451_s11, 1 }
  0x35   : > { %1841 = sst [smem:[#allocation16_spill]] %s1864_s19  ;;  %p1508_p6 = por %p58_p4, %p57_p2 }
  0x36   : > { %p1514_p10 = por %p1843_p8, %p57_p2  ;;  %s45_s18 = ssub.s32 %s1336_s9, %s1864_s19 }
  0x37   : > { %p1052_p12 = scmp.lt.s32.totalorder %s1340_s10, 2  ;;  %p48_p11 = scmp.eq.s32.totalorder %s45_s18, 0 }
  0x38   : > { %s319_s17 = sand.u32 1, %s1328_s29   ;;  %s959_s21 = sshll.u32 %s1336_s9, 7 }
  0x39   : > { %s958_s16 = sshll.u32 %s319_s17, 3  ;;  %s1845_s0 = sld [smem:[#allocation17_spill]] }
  0x3a   : > { %s1523_s20 = scalar_select %p48_p11, %s1328_s29, %s50_s24  }
  0x3b   : > { %s323_s3 = scalar_lea.vmem [#allocation2], %s958_s16  ;;  %p1535_p13 = pnand %p1052_p12, %p1508_p6 }
  0x3c   : > { %s331_s14 = sshll.u32 %s323_s3, 4  ;;  %s320_s24 = scalar_lea.sflag [#allocation3], %s319_s17  ;;  %s1531_s14 = int_to_ptr.vmem [resolvable:$true] %s331_s14 }
  0x3d   : > { %p1166_p3 = pneg %p1535_p13 }
  0x3f   : > { %s1529_s12 = scalar_lea.hbm %s1845_s0, %s959_s21  ;;  %s1169_s21 = scalar_lea.hbm %s1845_s0, 256 }
  0x40   : > { %s1164_s19 = scalar_lea.hbm %s1529_s12, 128  ;;  %p1170_p9 = scmp.lt.u32.totalorder %s1529_s12, %s1845_s0 }
  0x41   : > { %p1165_p0 = scmp.ne.s32.totalorder %s1529_s12, %s1164_s19  ;;  %p1171_p1 = scmp.lt.u32.totalorder %s1169_s21, %s1164_s19 }
  0x42   : > { %p1173_p4 = scmp.lt.u32.totalorder %s1164_s19, %s1529_s12 }
  0x43   : > { %p1167_p5 = pnand %p1166_p3, %p1165_p0  ;;  %p1172_p2 = por %p1171_p1, %p1170_p9 }
  0x45   : > { %p1168_p7 = pneg %p1167_p5  ;;  %p1174_p6 = por %p1173_p4, %p1172_p2 }
  0x47   : > { %p1175_p8 = pnand %p1174_p6, %p1168_p7 }
  0x49   : > { %1178 = shalt.err (!%p1175_p8)
}
  0x4a   : > { %s1179_s17 = scalar_lea.vmem %s1531_s14, 128  ;;  %s1345_s23 = smov [#allocation2]  }
  0x4b   : > { %p1180_p12 = scmp.ne.s32.totalorder %s1531_s14, %s1179_s17  ;;  %s1184_s16 = sshll.u32 %s1345_s23, 4  ;;  %s1185_s16 = int_to_ptr.vmem [resolvable:$false] %s1184_s16 }
  0x4c   : > { %s1186_s3 = scalar_lea.vmem %s1185_s16, 256  ;;  %p1187_p5 = scmp.lt.s32.totalorder %s1531_s14, %s1185_s16 }
  0x4d   : > { %p1182_p11 = pnand %p1180_p12, %p1166_p3  ;;  %p1188_p9 = scmp.lt.s32.totalorder %s1186_s3, %s1179_s17 }
  0x4f   : > { %p1183_p0 = pneg %p1182_p11  ;;  %p1189_p1 = por %p1188_p9, %p1187_p5 }
  0x51   : > { %p1190_p2 = pnand %p1189_p1, %p1183_p0 }
  0x53   : > { %1193 = shalt.err (!%p1190_p2)
}
  0x54   : > { %1040 = dma.hbm_to_vmem [thread:$0]  (!%p1535_p13), %s1529_s12, 128, %s1531_s14, %s320_s24  }
  0x55   : > { %p1847_p7 = scmp.ne.s32.totalorder %s1838_s15, 0 }
  0x56   : > { %s1567_s19 = sand.u32 (!%p1847_p7), 1, %s1324_s28   ;;  %p1848_p3 = scmp.ne.s32.totalorder (!%p1847_p7), %s1835_s13, 0 }
  0x57   : > { %340 = sbr.rel (%p1847_p7) target bundleno = 1051 (0x41b), region = 44  ;;  %s961_s21 = sshll.u32 (!%p1847_p7), %s1567_s19, 3 }
  0x58   : > { %s343_s25 = scalar_lea.sflag (!%p1847_p7), [#allocation3], %s1567_s19  ;;  %s346_s22 = scalar_lea.vmem (!%p1847_p7), [#allocation2], %s961_s21 }
  0x5e   : > { %1303 = dma.done.wait (%p1848_p3), %s343_s25, 128  }
  0x5f   : > { %1305 = vsyncadd (%p1848_p3), %s343_s25, 4294967168  ;;  %p1849_p4 = scmp.eq.s32.totalorder %s1451_s11, 0 }
  0x61   : > { %1307 = dma.done.wait (%p1849_p4), [#allocation6], 256   ;;  %p1850_p13 = pmov %p1849_p4 }
  0x62   : > { %vm413_vm0 = vcmask 261120   ;;  %v410_v0 = vld [vmem:[%s346_s22] sm:$0xff]  ;;  %v1132_v7 = vld [vmem:[#allocation5] sm:$0xff]   ;;  %v1346_v8 = vmov 0.0   ;;  %vm1347_vm1 = vmmov 0   ;;  %v1133_v9 = vld [vmem:[#allocation5 + $0x8] sm:$0xff]  }
  0x63   : > { %1309 = vsyncadd (%p1850_p13), [#allocation6], 4294967040  ;;  %v414_v1 = vsel %vm413_vm0, %v410_v0, 0.0  ;;  %1013 = vmatprep.subr.bf16.mxu0 %v1346_v8  ;;  %1017 = vmatprep.mubr.msk.bf16.mxu0 %vm1347_vm1, %v1346_v8  ;;  %v966_v14 = vld [vmem:[%s1815_s1] ss:$0 sm:$0xff]  ;;  %s1348_s17 = smov 84  }
  0x64   : > { %415 = vadd.xlane.f32.xlu0 %v414_v1  ;;  %1014 = vmatpush3.bf16.msra.mxu0 %v1132_v7  ;;  %v967_v16 = vld [vmem:[%s1816_s2] ss:$0 sm:$0xff]  ;;  %s1349_s23 = smov 92   ;;  %s1350_s16 = smov 40   ;;  %vm512_vm2 = vcmask 31744   ;;  %vm517_vm3 = vcmask 60416  }
  0x65   : > { %1015 = vmatprep.subr.bf16.mxu0 %v1346_v8  ;;  %v502_v20 = vld [vmem:[%s1818_s4] sm:$0xff]  ;;  %s1351_s3 = smov 100   ;;  %s1352_s21 = smov 56  }
  0x66   : > { %s1353_s25 = smov 76   ;;  %s1354_s22 = smov 16   ;;  %v1612_v26 = vld [vmem:[%s1819_s5] sm:$0xff] }
  0x67   : > { %s1355_s12 = smov 68   ;;  %s1356_s13 = smov 124  }
  0x68   : > { %1016 = vmatpush3.bf16.msra.mxu0 %v1133_v9  ;;  %s1357_s14 = smov 116   ;;  %s1358_s15 = smov 108  }
  0x69   : > { %s1359_s18 = smov 32   ;;  %s1360_s24 = smov 48  }
  0xf1   : > { %v416_v2 = vpop.xlane.xlu0 %415 }
  0xf2   : > { %v418_v3 = vmul.f32 0.03125, %v416_v2 }
  0xf4   : > { %v419_v4 = vsub.f32 %v410_v0, %v418_v3 }
  0xf6   : > { %v420_v5 = vmul.f32 %v419_v4, %v419_v4 }
  0xf8   : > { %v421_v6 = vsel %vm413_vm0, %v420_v5, 0.0 }
  0xf9   : > { %422 = vadd.xlane.f32.xlu0 %v421_v6 }
 0x186   : > { %v423_v10 = vpop.xlane.xlu0 %422 }
 0x187   : > { %v424_v11 = vmul.f32 0.03125, %v423_v10 }
 0x189   : > { %v425_v12 = vadd.f32 1e-05, %v424_v11 }
 0x18b   : > { %1134 = vrsqrt.f32 %v425_v12 }
 0x195   : > { %v1135_v13 = vpop.eup %1134 }
 0x196   : > { %v427_v15 = vmul.f32 %v1135_v13, %v419_v4 }
 0x198   : > { %v434_v17 = vmul.f32 %v966_v14, %v427_v15 }
 0x19a   : > { %v441_v18 = vadd.f32 %v967_v16, %v434_v17 }
 0x19c   : > { %v442_v19 = vpack.c.bf16 %v441_v18, %v441_v18 }
 0x19e   : > { %1018 = vmatmul.mubr.msk.bf16.vlgmr.msra.gmra.mrb[0].mxu0 %vm413_vm0, %v442_v19 }
 0x271   : > { %v1591_v21 = vpop.f32.mrb[0].mxu0 }
 0x272   : > { %580 = vrot.lane.b32.xlu0 %v1591_v21, %s1348_s17  ;;  %524 = vrot.lane.b32.xlu1 %v1591_v21, %s1349_s23  ;;  %v1019_v22 = vpop.f32.mrb[1].mxu0  ;;  %v1596_v23 = vmul.f32 %v502_v20, %v1591_v21  ;;  %s1361_s17 = smov 8   ;;  %s1362_s23 = smov 24   ;;  %v1000_v49 = vpack.c.bf16 %v1591_v21, %v1591_v21 }
 0x273   : > { %v499_v24 = vpop.f32.mrb[2].mxu0 }
 0x274   : > { %v1020_v25 = vpop.f32.mrb[3].mxu0 }
 0x276   : > { %576 = vrot.lane.b32.xlu0 %v502_v20, %s1350_s16  ;;  %527 = vrot.lane.b32.xlu1 %v1591_v21, %s1351_s3 }
 0x27a   : > { %675 = vrot.lane.b32.xlu0 %v502_v20, %s1352_s21  ;;  %631 = vrot.lane.b32.xlu1 %v1591_v21, %s1353_s25 }
 0x27e   : > { %604 = vrot.lane.b32.xlu0 %v502_v20, %s1354_s22  ;;  %679 = vrot.lane.b32.xlu1 %v1591_v21, %s1355_s12  ;;  %s1831_s12 = smov 4  }
 0x282   : > { %506 = vrot.lane.b32.xlu1 %v1591_v21, %s1356_s13  ;;  %s1829_s13 = smov 64  }
 0x286   : > { %557 = vrot.lane.b32.xlu1 %v1591_v21, %s1357_s14  ;;  %s1367_s14 = smov 80  }
 0x28a   : > { %608 = vrot.lane.b32.xlu1 %v1591_v21, %s1358_s15  ;;  %s1368_s15 = smov 72  }
 0x28e   : > { %520 = vrot.lane.b32.xlu1 %v502_v20, %s1359_s18 }
 0x292   : > { %627 = vrot.lane.b32.xlu1 %v502_v20, %s1360_s24 }
 0x296   : > { %553 = vrot.lane.b32.xlu1 %v502_v20, %s1361_s17 }
 0x29a   : > { %655 = vrot.lane.b32.xlu1 %v502_v20, %s1362_s23 }
 0x2e4   : > { %v581_v27 = vpop.permute.xlu0 %580  ;;  %v525_v28 = vpop.permute.xlu1 %524 }
 0x2e5   : > { %v583_v29 = vsel %vm512_vm2, %v581_v27, %v525_v28 }
 0x2e6   : > { %v584_v30 = vmul.f32 %v583_v29, %v1612_v26 }
 0x2e8   : > { %586 = vrot.lane.b32.xlu1 %v584_v30, %s1350_s16  ;;  %v528_v31 = vpop.permute.xlu1 %527  ;;  %v577_v52 = vpop.permute.xlu0 %576 }
 0x2e9   : > { %v530_v32 = vsel %vm512_vm2, %v525_v28, %v528_v31  ;;  %v579_v56 = vmul.f32 %v577_v52, %v1591_v21 }
 0x2ea   : > { %v531_v33 = vmul.f32 %v530_v32, %v1612_v26 }
 0x2ec   : > { %533 = vrot.lane.b32.xlu0 %v531_v33, %s1359_s18  ;;  %v632_v34 = vpop.permute.xlu1 %631  ;;  %v676_v54 = vpop.permute.xlu0 %675  ;;  %s963_s18 = sshll.u32 %s1567_s19, 4 }
 0x2ed   : > { %v634_v35 = vsel %vm512_vm2, %v632_v34, %v581_v27  ;;  %v678_v4 = vmul.f32 %v676_v54, %v1591_v21  ;;  %s1662_s3 = scalar_lea.vmem [#allocation7], %s963_s18  ;;  %s393_s25 = scalar_lea.vmem [#allocation8], %s963_s18 }
 0x2ee   : > { %v635_v36 = vmul.f32 %v634_v35, %v1612_v26 }
 0x2f0   : > { %637 = vrot.lane.b32.xlu0 %v635_v36, %s1360_s24  ;;  %v680_v37 = vpop.permute.xlu1 %679  ;;  %v605_v57 = vpop.permute.xlu0 %604 }
 0x2f1   : > { %v682_v38 = vsel %vm512_vm2, %v680_v37, %v632_v34  ;;  %v607_v12 = vmul.f32 %v605_v57, %v1591_v21 }
 0x2f2   : > { %v683_v39 = vmul.f32 %v682_v38, %v1612_v26 }
 0x2f4   : > { %685 = vrot.lane.b32.xlu1 %v683_v39, %s1352_s21  ;;  %v1625_v40 = vpop.permute.xlu1 %506 }
 0x2f8   : > { %v558_v41 = vpop.permute.xlu1 %557 }
 0x2f9   : > { %v560_v42 = vsel %vm512_vm2, %v558_v41, %v1625_v40 }
 0x2fa   : > { %v561_v43 = vmul.f32 %v560_v42, %v1612_v26 }
 0x2fc   : > { %563 = vrot.lane.b32.xlu0 %v561_v43, %s1361_s17  ;;  %v609_v44 = vpop.permute.xlu1 %608  ;;  %s1370_s17 = smov 112  }
 0x2fd   : > { %v611_v45 = vsel %vm512_vm2, %v609_v44, %v558_v41  ;;  %v659_v46 = vsel %vm512_vm2, %v528_v31, %v609_v44 }
 0x2fe   : > { %v612_v47 = vmul.f32 %v611_v45, %v1612_v26  ;;  %v660_v48 = vmul.f32 %v659_v46, %v1612_v26 }
 0x300   : > { %662 = vrot.lane.b32.xlu0 %v660_v48, %s1362_s23  ;;  %614 = vrot.lane.b32.xlu1 %v612_v47, %s1354_s22  ;;  %v521_v50 = vpop.permute.xlu1 %520  ;;  %s1365_s22 = smov 88   ;;  %s1371_s23 = smov 104  }
 0x301   : > { %v523_v60 = vmul.f32 %v521_v50, %v1591_v21 }
 0x304   : > { %509 = vrot.lane.b32.xlu1 %v1591_v21, %s1831_s12  ;;  %549 = vrot.lane.b32.xlu0 %v1000_v49, %s1829_s13  ;;  %v628_v51 = vpop.permute.xlu1 %627 }
 0x305   : > { %v630_v0 = vmul.f32 %v628_v51, %v1591_v21 }
 0x308   : > { %599 = vrot.lane.b32.xlu0 %v1000_v49, %s1352_s21  ;;  %v554_v53 = vpop.permute.xlu1 %553  ;;  %s1366_s21 = smov 96  }
 0x309   : > { %v556_v9 = vmul.f32 %v554_v53, %v1591_v21 }
 0x30c   : > { %650 = vrot.lane.b32.xlu0 %v1000_v49, %s1360_s24  ;;  %v656_v55 = vpop.permute.xlu1 %655  ;;  %s1369_s24 = smov 120  }
 0x30d   : > { %v658_v16 = vmul.f32 %v656_v55, %v1591_v21 }
 0x35a   : > { %v587_v58 = vpop.permute.xlu1 %586 }
 0x35b   : > { %v589_v59 = vadd.f32 %v587_v58, %v579_v56 }
 0x35d   : > { %v1002_v61 = vpack.c.bf16 %v589_v59, %v589_v59 }
 0x35e   : > { %v534_v62 = vpop.permute.xlu0 %533 }
 0x35f   : > { %v536_v63 = vadd.f32 %v534_v62, %v523_v60  ;;  %594 = vrot.lane.b32.xlu1 %v1002_v61, %s1365_s22  ;;  %s745_s22 = sshll.u32 %s393_s25, 4  ;;  %s1676_s22 = int_to_ptr.vmem [resolvable:$true] %s745_s22 }
 0x361   : > { %v999_v1 = vpack.c.bf16 %v536_v63, %v536_v63 }
 0x362   : > { %v638_v2 = vpop.permute.xlu0 %637 }
 0x363   : > { %v640_v3 = vadd.f32 %v638_v2, %v630_v0  ;;  %541 = vrot.lane.b32.xlu0 %v999_v1, %s1366_s21  ;;  %s708_s21 = sand.u32 1, %s1451_s11  }
 0x364   : > { %s1695_s13 = scalar_lea.sflag [#allocation9], %s708_s21 }
 0x365   : > { %v1004_v5 = vpack.c.bf16 %v640_v3, %v640_v3 }
 0x366   : > { %v686_v6 = vpop.permute.xlu1 %685 }
 0x367   : > { %v688_v7 = vadd.f32 %v686_v6, %v678_v4  ;;  %645 = vrot.lane.b32.xlu0 %v1004_v5, %s1367_s14  ;;  %s1672_s14 = sshll.u32 %s1332_s30, 8 }
 0x369   : > { %v1006_v8 = vpack.c.bf16 %v688_v7, %v688_v7 }
 0x36b   : > { %693 = vrot.lane.b32.xlu1 %v1006_v8, %s1368_s15  ;;  %698 = vrot.lane.b32.xlu0 %v1000_v49, %s1350_s16  ;;  %s1654_s16 = scalar_lea.vmem [#allocation10], %s963_s18  ;;  %s1194_s18 = scalar_lea.vmem %s1676_s22, 256 }
 0x36c   : > { %s762_s15 = sshll.u32 %s1654_s16, 4  ;;  %p1195_p6 = scmp.ne.s32.totalorder %s1676_s22, %s1194_s18  ;;  %s1684_s15 = int_to_ptr.vmem [resolvable:$true] %s762_s15 }
 0x36e   : > { %v564_v10 = vpop.permute.xlu0 %563  ;;  %p1196_p8 = pnand %p1195_p6, %p1514_p10 }
 0x36f   : > { %v566_v11 = vadd.f32 %v564_v10, %v556_v9 }
 0x370   : > { %p1197_p12 = pneg %p1196_p8 }
 0x371   : > { %v1001_v13 = vpack.c.bf16 %v566_v11, %v566_v11 }
 0x372   : > { %v663_v14 = vpop.permute.xlu0 %662  ;;  %v615_v15 = vpop.permute.xlu1 %614 }
 0x373   : > { %v617_v17 = vadd.f32 %v615_v15, %v607_v12  ;;  %571 = vrot.lane.b32.xlu1 %v1001_v13, %s1369_s24  ;;  %v665_v18 = vadd.f32 %v663_v14, %v658_v16  ;;  %s1372_s24 = smov [#allocation8]  }
 0x374   : > { %s1198_s12 = sshll.u32 %s1372_s24, 4  ;;  %s1199_s12 = int_to_ptr.vmem [resolvable:$false] %s1198_s12 }
 0x375   : > { %v1003_v19 = vpack.c.bf16 %v617_v17, %v617_v17  ;;  %v1005_v25 = vpack.c.bf16 %v665_v18, %v665_v18  ;;  %s1200_s0 = scalar_lea.vmem %s1199_s12, 512  ;;  %p1201_p11 = scmp.lt.s32.totalorder %s1676_s22, %s1199_s12 }
 0x376   : > { %v510_v20 = vpop.permute.xlu1 %509  ;;  %v550_v22 = vpop.permute.xlu0 %549  ;;  %p1202_p0 = scmp.lt.s32.totalorder %s1200_s0, %s1194_s18 }
 0x377   : > { %v513_v24 = vsel %vm512_vm2, %v1625_v40, %v510_v20  ;;  %552 = vst.msk [vmem:[%s1654_s16] sm:$0xf] %vm517_vm3, %v550_v22  ;;  %622 = vrot.lane.b32.xlu1 %v1003_v19, %s1370_s17  ;;  %s1682_s17 = scalar_lea.hbm %s1821_s7, %s1672_s14 }
 0x378   : > { %v514_v21 = vmul.f32 %v513_v24, %v1612_v26  ;;  %p1203_p5 = por %p1202_p0, %p1201_p11 }
 0x37a   : > { %v515_v27 = vadd.f32 %v514_v21, %v1596_v23  ;;  %v600_v28 = vpop.permute.xlu0 %599  ;;  %p1204_p9 = pnand %p1203_p5, %p1197_p12 }
 0x37b   : > { %977 = vst.msk [vmem:[%s1654_s16 + $0x4] sm:$0xf] %vm517_vm3, %v600_v28  ;;  %670 = vrot.lane.b32.xlu1 %v1005_v25, %s1371_s23  ;;  %s1690_s23 = scalar_lea.hbm %s1822_s8, %s1672_s14 }
 0x37c   : > { %v516_v29 = vpack.c.bf16 %v515_v27, %v515_v27 }
 0x37e   : > { %v651_v30 = vpop.permute.xlu0 %650  ;;  %518 = vst.msk [vmem:[%s1662_s3] sm:$0xf] %vm517_vm3, %v516_v29 }
 0x37f   : > { %982 = vst.msk [vmem:[%s1654_s16 + $0x8] sm:$0xf] %vm517_vm3, %v651_v30 }
 0x3d1   : > { %v595_v26 = vpop.permute.xlu1 %594 }
 0x3d2   : > { %976 = vst.msk [vmem:[%s393_s25 + $0x4] sm:$0xf] %vm517_vm3, %v595_v26 }
 0x3d5   : > { %v542_v23 = vpop.permute.xlu0 %541 }
 0x3d6   : > { %544 = vst.msk [vmem:[%s393_s25] sm:$0xf] %vm517_vm3, %v542_v23 }
 0x3d9   : > { %v646_v31 = vpop.permute.xlu0 %645 }
 0x3da   : > { %981 = vst.msk [vmem:[%s393_s25 + $0x8] sm:$0xf] %vm517_vm3, %v646_v31 }
 0x3dd   : > { %v694_v32 = vpop.permute.xlu1 %693  ;;  %v699_v33 = vpop.permute.xlu0 %698 }
 0x3de   : > { %986 = vst.msk [vmem:[%s393_s25 + $0xc] sm:$0xf] %vm517_vm3, %v694_v32  ;;  %987 = vst.msk [vmem:[%s1654_s16 + $0xc] sm:$0xf] %vm517_vm3, %v699_v33 }
 0x3df   : > { %1207 = shalt.err (!%p1204_p9)
}
 0x3e0   : > { %s1208_s16 = scalar_lea.hbm %s1682_s17, 256  ;;  %s1212_s30 = scalar_lea.hbm %s1821_s7, 512 }
 0x3e1   : > { %p1209_p1 = scmp.ne.s32.totalorder %s1682_s17, %s1208_s16  ;;  %p1213_p3 = scmp.lt.u32.totalorder %s1682_s17, %s1821_s7 }
 0x3e2   : > { %p1214_p4 = scmp.lt.u32.totalorder %s1212_s30, %s1208_s16  ;;  %p1216_p6 = scmp.lt.u32.totalorder %s1208_s16, %s1682_s17 }
 0x3e3   : > { %p1210_p2 = pnand %p1209_p1, %p1514_p10 }
 0x3e4   : > { %p1215_p13 = por %p1214_p4, %p1213_p3 }
 0x3e5   : > { %p1211_p7 = pneg %p1210_p2 }
 0x3e6   : > { %p1217_p8 = por %p1216_p6, %p1215_p13 }
 0x3e8   : > { %p1218_p12 = pnand %p1217_p8, %p1211_p7 }
 0x3ea   : > { %1221 = shalt.err (!%p1218_p12)
}
 0x3eb   : > { %s1851_s0 = smov 4   ;;  %s1852_s18 = smov 64  }
 0x3ec   : > { %1028 = dma.vmem_to_hbm [thread:$0]  (%p1514_p10), %s1676_s22, 256, %s1682_s17, %s1695_s13, %s1852_s18, %s1852_s18, %s1851_s0  }
 0x3ed   : > { %s1222_s24 = scalar_lea.vmem %s1684_s15, 256  ;;  %s1373_s16 = smov [#allocation10]  }
 0x3ee   : > { %p1223_p11 = scmp.ne.s32.totalorder %s1684_s15, %s1222_s24  ;;  %s1226_s25 = sshll.u32 %s1373_s16, 4  ;;  %s1227_s25 = int_to_ptr.vmem [resolvable:$false] %s1226_s25 }
 0x3ef   : > { %s1228_s21 = scalar_lea.vmem %s1227_s25, 512  ;;  %p1229_p9 = scmp.lt.s32.totalorder %s1684_s15, %s1227_s25 }
 0x3f0   : > { %p1224_p0 = pnand %p1223_p11, %p1514_p10  ;;  %p1230_p1 = scmp.lt.s32.totalorder %s1228_s21, %s1222_s24 }
 0x3f2   : > { %p1225_p5 = pneg %p1224_p0  ;;  %p1231_p2 = por %p1230_p1, %p1229_p9 }
 0x3f4   : > { %p1232_p7 = pnand %p1231_p2, %p1225_p5 }
 0x3f6   : > { %1235 = shalt.err (!%p1232_p7)
}
 0x3f7   : > { %s1236_s22 = scalar_lea.hbm %s1690_s23, 256  ;;  %s1240_s11 = scalar_lea.hbm %s1822_s8, 512 }
 0x3f8   : > { %p1237_p3 = scmp.ne.s32.totalorder %s1690_s23, %s1236_s22  ;;  %p1241_p6 = scmp.lt.u32.totalorder %s1690_s23, %s1822_s8 }
 0x3f9   : > { %p1242_p8 = scmp.lt.u32.totalorder %s1240_s11, %s1236_s22  ;;  %p1244_p11 = scmp.lt.u32.totalorder %s1236_s22, %s1690_s23 }
 0x3fa   : > { %p1238_p4 = pnand %p1237_p3, %p1514_p10 }
 0x3fb   : > { %p1243_p12 = por %p1242_p8, %p1241_p6 }
 0x3fc   : > { %p1239_p13 = pneg %p1238_p4 }
 0x3fd   : > { %p1245_p0 = por %p1244_p11, %p1243_p12 }
 0x3ff   : > { %p1246_p5 = pnand %p1245_p0, %p1239_p13 }
 0x401   : > { %1249 = shalt.err (!%p1246_p5)
}
 0x402   : > { %1029 = dma.vmem_to_hbm [thread:$0]  (%p1514_p10), %s1684_s15, 256, %s1690_s23, %s1695_s13, %s1852_s18, %s1852_s18, %s1851_s0   ;;  %v572_v34 = vpop.permute.xlu1 %571 }
 0x403   : > { %974 = vst.msk [vmem:[%s1662_s3 + $0x4] sm:$0xf] %vm517_vm3, %v572_v34  ;;  %s728_s24 = sshll.u32 %s1662_s3, 4  ;;  %s1758_s22 = scalar_lea.hbm %s1820_s6, %s1672_s14  ;;  %s1752_s24 = int_to_ptr.vmem [resolvable:$true] %s728_s24 }
 0x404   : > { %s704_s13 = scalar_lea.sflag [#allocation4], %s1567_s19  ;;  %s1250_s15 = scalar_lea.vmem %s1752_s24, 256 }
 0x405   : > { %p1251_p9 = scmp.ne.s32.totalorder %s1752_s24, %s1250_s15  ;;  %s1374_s23 = smov [#allocation7]  }
 0x406   : > { %v623_v35 = vpop.permute.xlu1 %622  ;;  %s1254_s17 = sshll.u32 %s1374_s23, 4  ;;  %s1255_s17 = int_to_ptr.vmem [resolvable:$false] %s1254_s17 }
 0x407   : > { %979 = vst.msk [vmem:[%s1662_s3 + $0x8] sm:$0xf] %vm517_vm3, %v623_v35  ;;  %p1252_p1 = pnand %p1251_p9, %p1514_p10  ;;  %s1256_s30 = scalar_lea.vmem %s1255_s17, 512 }
 0x408   : > { %p1257_p7 = scmp.lt.s32.totalorder %s1752_s24, %s1255_s17  ;;  %p1258_p3 = scmp.lt.s32.totalorder %s1256_s30, %s1250_s15 }
 0x409   : > { %p1253_p2 = pneg %p1252_p1 }
 0x40a   : > { %v671_v36 = vpop.permute.xlu1 %670  ;;  %p1259_p4 = por %p1258_p3, %p1257_p7 }
 0x40b   : > { %984 = vst.msk [vmem:[%s1662_s3 + $0xc] sm:$0xf] %vm517_vm3, %v671_v36 }
 0x40c   : > { %p1260_p13 = pnand %p1259_p4, %p1253_p2 }
 0x40e   : > { %1263 = shalt.err (!%p1260_p13)
}
 0x40f   : > { %s1264_s3 = scalar_lea.hbm %s1758_s22, 256  ;;  %s1268_s12 = scalar_lea.hbm %s1820_s6, 512 }
 0x410   : > { %p1265_p6 = scmp.ne.s32.totalorder %s1758_s22, %s1264_s3  ;;  %p1269_p11 = scmp.lt.u32.totalorder %s1758_s22, %s1820_s6 }
 0x411   : > { %p1270_p0 = scmp.lt.u32.totalorder %s1268_s12, %s1264_s3  ;;  %p1272_p9 = scmp.lt.u32.totalorder %s1264_s3, %s1758_s22 }
 0x412   : > { %p1266_p8 = pnand %p1265_p6, %p1514_p10 }
 0x413   : > { %p1271_p5 = por %p1270_p0, %p1269_p11 }
 0x414   : > { %p1267_p12 = pneg %p1266_p8 }
 0x415   : > { %p1273_p1 = por %p1272_p9, %p1271_p5 }
 0x417   : > { %p1274_p2 = pnand %p1273_p1, %p1267_p12 }
 0x419   : > { %1277 = shalt.err (!%p1274_p2)
}
 0x41a   : > { %1027 = dma.vmem_to_hbm [thread:$0]  (%p1514_p10), %s1752_s24, 256, %s1758_s22, %s704_s13, %s1852_s18, %s1852_s18, %s1851_s0  }
 0x41b PF: > { %s1853_s21 = sld [smem:[#allocation15_spill]]  ;;  %s777_s15 = sand.u32 1, %s1320_s27  }
 0x41c   : > { %p1855_p3 = scmp.ge.s32.totalorder %s1340_s10, 2  ;;  %s778_s23 = scalar_lea.sflag [#allocation4], %s777_s15 }
 0x421   : > { %p1854_p7 = scmp.ne.s32.totalorder %s1853_s21, 0 }
 0x423   : > { %p1042_p4 = pnand %p1855_p3, %p1854_p7 }
 0x425   : > { %1311 = dma.done.wait (!%p1042_p4), %s778_s23, 256  }
 0x426   : > { %1313 = vsyncadd (!%p1042_p4), %s778_s23, 4294967040  ;;  %s1856_s26 = sadd.s32 4294967294, %s1340_s10  }
 0x427   : > { %s786_s17 = sand.u32 1, %s1856_s26  }
 0x428   : > { %s787_s30 = scalar_lea.sflag [#allocation9], %s786_s17 }
 0x429   : > { %1315 = dma.done.wait (!%p1042_p4), %s787_s30, 512  }
 0x42a   : > { %1317 = vsyncadd (!%p1042_p4), %s787_s30, 4294966784  ;;  %s29_s10 = sadd.s32 1, %s1340_s10   ;;  %s1857_s19 = sld [smem:[#allocation16_spill]] }
 0x42b   : > { %p26_p10 = scmp.ge.s32.totalorder %s29_s10, 4   ;;  %s1858_s27 = smov %s1324_s28 }
 0x42c   : > { %s1859_s28 = smov %s1328_s29  ;;  %s1860_s29 = smov %s1523_s20 }
 0x42d   : > { %s1861_s30 = smov %s1336_s9  ;;  %28 = sbr.rel (!%p26_p10) target bundleno = 12 (0xc), region = 140 }
 0x430   : > { %s1862_s9 = smov %s1857_s19 }
 0x434   :  { %801 = vsyncpa [#allocation3], 1 }
 0x435   :  { %803 = vsyncpa [#allocation3 + $0x1], 1 }
 0x436   :  { %804 = vsyncpa [#allocation6], 1 }
 0x437   :  { %805 = vsyncpa [#allocation4], 1 }
 0x438   :  { %807 = vsyncpa [#allocation4 + $0x1], 1 }
 0x439   :  { %808 = vsyncpa [#allocation9], 1 }
 0x43a   :  { %810 = vsyncpa [#allocation9 + $0x1], 1 }

</bundles_post_ra>
